<compile_context>
chip_gen: v6e
topology: v6e:2x2x1
jax: 0.10.0
libtpu: 0.0.40
codegen_flags: <defaults>
</compile_context>

<pallas_src>
import functools

import jax
import jax.numpy as jnp
from jax import lax
from jax.experimental import pallas as pl
from jax.experimental.pallas import tpu as pltpu


def _channel_gate_kernel(x_ref, w1t_ref, b1_ref, w2t_ref, b2_ref, o_ref, *, hw_true):
    # x_ref block: (Bt, C, HWp) f32
    # w1t: (C, Cr), b1: (1, Cr), w2t: (Cr, C), b2: (1, C)
    xb = x_ref[...]
    bt, c, hwp = xb.shape

    # ---- global pools over the (padded) spatial lane axis -------------------
    # pads (if any) are zero -> the sum is unaffected; divide by the true HW.
    avg_pool = jnp.sum(xb, axis=2) * (1.0 / hw_true)          # (Bt, C)

    if hwp != hw_true:
        lane = lax.broadcasted_iota(jnp.int32, xb.shape, 2)
        x_for_max = jnp.where(lane < hw_true, xb, -jnp.inf)
    else:
        x_for_max = xb
    max_pool = jnp.max(x_for_max, axis=2)                     # (Bt, C)

    # ---- shared 2-layer MLP, run ONCE on the stacked pools -------------------
    pooled = jnp.concatenate([avg_pool, max_pool], axis=0)    # (2*Bt, C)
    h = jnp.dot(pooled, w1t_ref[...],
                preferred_element_type=jnp.float32) + b1_ref[...]   # (2*Bt, Cr)
    h = jnp.maximum(h, 0.0)                                          # ReLU
    att2 = jnp.dot(h, w2t_ref[...],
                   preferred_element_type=jnp.float32) + b2_ref[...]  # (2*Bt, C)

    att = att2[:bt] + att2[bt:]                                # (Bt, C)  avg + max branch
    scale = jax.nn.sigmoid(att)                                # (Bt, C)

    # single broadcast over the spatial lanes, then the gated output store
    scale3 = lax.broadcast_in_dim(scale, xb.shape, (0, 1))     # (Bt, C, HWp)
    o_ref[...] = xb * scale3


def channel_gate(x, w1, b1, w2, b2, *, target_block_bytes=4 << 20):
    """x: (B, C, H, W) f32.  w1: (C//r, C), b1: (C//r,), w2: (C, C//r), b2: (C,)."""
    B, C, H, W = x.shape
    Cr = w1.shape[0]
    HW = H * W
    HWp = ((HW + 127) // 128) * 128            # lane-dense last dim

    x_flat = x.reshape(B, C, HW)
    if HWp != HW:
        x_flat = jnp.pad(x_flat, ((0, 0), (0, 0), (0, HWp - HW)))

    # Pre-transpose the nn.Linear weights so the kernel does plain row-major
    # (M, K) @ (K, N) matmuls; biases as broadcastable rows.
    w1t = jnp.transpose(w1)                    # (C, Cr)
    w2t = jnp.transpose(w2)                    # (Cr, C)
    b1_2d = b1.reshape(1, Cr)
    b2_2d = b2.reshape(1, C)

    # Pick the per-step batch tile: biggest Bt dividing B whose block stays
    # within the VMEM budget (double-buffered in + out must fit the scoped
    # limit), preferring >=2 grid steps (v7x megacore) when blocks stay large.
    row_bytes = C * HWp * 4
    bt = max(1, min(B, max(1, target_block_bytes // row_bytes)))
    if bt == B and B > 1 and (B // 2) * row_bytes >= (1 << 20):
        bt = B // 2
    while B % bt != 0:
        bt -= 1

    kernel = functools.partial(_channel_gate_kernel, hw_true=HW)

    out_flat = pl.pallas_call(
        kernel,
        out_shape=jax.ShapeDtypeStruct((B, C, HWp), x.dtype),
        grid_spec=pltpu.PrefetchScalarGridSpec(
            num_scalar_prefetch=0,
            grid=(B // bt,),
            in_specs=[
                pl.BlockSpec((bt, C, HWp), lambda i: (i, 0, 0)),  # x slab
                pl.BlockSpec((C, Cr), lambda i: (0, 0)),          # w1^T (resident)
                pl.BlockSpec((1, Cr), lambda i: (0, 0)),          # b1
                pl.BlockSpec((Cr, C), lambda i: (0, 0)),          # w2^T
                pl.BlockSpec((1, C), lambda i: (0, 0)),           # b2
            ],
            out_specs=pl.BlockSpec((bt, C, HWp), lambda i: (i, 0, 0)),
        ),
        compiler_params=pltpu.CompilerParams(
            dimension_semantics=("parallel",),
            vmem_limit_bytes=32 * 1024 * 1024,
        ),
    )(x_flat, w1t, b1_2d, w2t, b2_2d)

    if HWp != HW:
        out_flat = out_flat[:, :, :HW]
    return out_flat.reshape(B, C, H, W)


def init_params(key, gate_channels, reduction_ratio=16):
    """Deterministic kaiming_normal (fan_in, relu) init; zero biases — matches weight_init."""
    c, cr = gate_channels, gate_channels // reduction_ratio
    k1, k2 = jax.random.split(key)
    # nn.Linear weight shape is (out_features, in_features); kaiming fan_in => std = sqrt(2/in).
    w1 = jax.random.normal(k1, (cr, c), jnp.float32) * jnp.sqrt(2.0 / c)
    b1 = jnp.zeros((cr,), jnp.float32)
    w2 = jax.random.normal(k2, (c, cr), jnp.float32) * jnp.sqrt(2.0 / cr)
    b2 = jnp.zeros((c,), jnp.float32)
    return w1, b1, w2, b2


def channel_gate_ref(x, w1, b1, w2, b2):
    """Pure-JAX reference for verification."""
    B, C, H, W = x.shape
    xf = x.reshape(B, C, H * W)
    avg = jnp.mean(xf, axis=2)   # (B, C)
    mx = jnp.max(xf, axis=2)     # (B, C)

    def mlp(p):  # (B, C)
        h = jnp.maximum(p @ w1.T + b1, 0.0)
        return h @ w2.T + b2

    att = mlp(avg) + mlp(mx)
    scale = jax.nn.sigmoid(att)[:, :, None, None]
    return x * scale


if __name__ == "__main__":
    key = jax.random.PRNGKey(0)
    kx, kp = jax.random.split(key)

    B, C, H, W = 2, 32, 16, 16          # gate_channels=32, reduction_ratio=16 -> hidden=2
    x = jax.random.normal(kx, (B, C, H, W), jnp.float32)
    w1, b1, w2, b2 = init_params(kp, C, reduction_ratio=16)

    out = channel_gate(x, w1, b1, w2, b2)
    out = jax.block_until_ready(out)

    ref = channel_gate_ref(x, w1, b1, w2, b2)
    assert out.shape == (B, C, H, W)
    assert jnp.allclose(out, ref, atol=1e-5, rtol=1e-5), \
        f"max abs err {jnp.max(jnp.abs(out - ref))}"

    print("KERNEL_OK")
</pallas_src>

<mosaic_0001>
module attributes {stable_mosaic.version = 11 : i64} {
  func.func @_channel_gate_kernel(%arg0: i32, %arg1: memref<2x32x256xf32, #tpu.memory_space<vmem>>, %arg2: memref<32x2xf32, #tpu.memory_space<vmem>>, %arg3: memref<1x2xf32, #tpu.memory_space<vmem>>, %arg4: memref<2x32xf32, #tpu.memory_space<vmem>>, %arg5: memref<1x32xf32, #tpu.memory_space<vmem>>, %arg6: memref<2x32x256xf32, #tpu.memory_space<vmem>>) attributes {dimension_semantics = [#tpu.dimension_semantics<parallel>], iteration_bounds = array<i64: 1>, scalar_prefetch = 0 : i64, scratch_operands = 0 : i64, tpu.core_type = #tpu.core_type<tc>, window_params = [{transform_indices = @transform_0, window_bounds = array<i64: 2, 32, 256>}, {pipeline_mode = #tpu.pipeline_mode<synchronous>, transform_indices = @transform_1, window_bounds = array<i64: 32, 2>}, {pipeline_mode = #tpu.pipeline_mode<synchronous>, transform_indices = @transform_2, window_bounds = array<i64: 1, 2>}, {pipeline_mode = #tpu.pipeline_mode<synchronous>, transform_indices = @transform_3, window_bounds = array<i64: 2, 32>}, {pipeline_mode = #tpu.pipeline_mode<synchronous>, transform_indices = @transform_4, window_bounds = array<i64: 1, 32>}, {transform_indices = @transform_5, window_bounds = array<i64: 2, 32, 256>}]} {
    %c0 = arith.constant 0 : index
    %c0_0 = arith.constant 0 : index
    %c0_1 = arith.constant 0 : index
    %0 = vector.load %arg1[%c0, %c0_0, %c0_1] : memref<2x32x256xf32, #tpu.memory_space<vmem>>, vector<2x32x256xf32>
    %cst = arith.constant dense<0.000000e+00> : vector<2x32xf32>
    %1 = vector.multi_reduction <add>, %0, %cst [2] : vector<2x32x256xf32> to vector<2x32xf32>
    %cst_2 = arith.constant 3.906250e-03 : f32
    %2 = vector.broadcast %cst_2 : f32 to vector<2x32xf32>
    %3 = arith.mulf %1, %2 : vector<2x32xf32>
    %cst_3 = arith.constant dense<0xFF800000> : vector<2x32xf32>
    %4 = vector.multi_reduction <maximumf>, %0, %cst_3 [2] : vector<2x32x256xf32> to vector<2x32xf32>
    %5 = tpu.concatenate %3, %4 in 0 : vector<2x32xf32>, vector<2x32xf32> -> vector<4x32xf32>
    %c0_4 = arith.constant 0 : index
    %c0_5 = arith.constant 0 : index
    %6 = vector.load %arg2[%c0_4, %c0_5] : memref<32x2xf32, #tpu.memory_space<vmem>>, vector<32x2xf32>
    %cst_6 = arith.constant dense<0.000000e+00> : vector<4x2xf32>
    %7 = tpu.matmul %5, %6, %cst_6 {dimension_numbers = #tpu.dot_dimension_numbers<[1], [0], [0], [1], [0, 0, 1, 1], [], []>} : vector<4x32xf32>, vector<32x2xf32>, vector<4x2xf32> -> vector<4x2xf32>
    %c0_7 = arith.constant 0 : index
    %c0_8 = arith.constant 0 : index
    %8 = vector.load %arg3[%c0_7, %c0_8] : memref<1x2xf32, #tpu.memory_space<vmem>>, vector<1x2xf32>
    %9 = vector.broadcast %8 : vector<1x2xf32> to vector<4x2xf32>
    %10 = arith.addf %7, %9 : vector<4x2xf32>
    %cst_9 = arith.constant 0.000000e+00 : f32
    %11 = vector.broadcast %cst_9 : f32 to vector<4x2xf32>
    %12 = arith.maximumf %10, %11 : vector<4x2xf32>
    %c0_10 = arith.constant 0 : index
    %c0_11 = arith.constant 0 : index
    %13 = vector.load %arg4[%c0_10, %c0_11] : memref<2x32xf32, #tpu.memory_space<vmem>>, vector<2x32xf32>
    %cst_12 = arith.constant dense<0.000000e+00> : vector<4x32xf32>
    %14 = tpu.matmul %12, %13, %cst_12 {dimension_numbers = #tpu.dot_dimension_numbers<[1], [0], [0], [1], [0, 0, 1, 1], [], []>} : vector<4x2xf32>, vector<2x32xf32>, vector<4x32xf32> -> vector<4x32xf32>
    %c0_13 = arith.constant 0 : index
    %c0_14 = arith.constant 0 : index
    %15 = vector.load %arg5[%c0_13, %c0_14] : memref<1x32xf32, #tpu.memory_space<vmem>>, vector<1x32xf32>
    %16 = vector.broadcast %15 : vector<1x32xf32> to vector<4x32xf32>
    %17 = arith.addf %14, %16 : vector<4x32xf32>
    %18 = vector.extract_strided_slice %17 {offsets = [0, 0], sizes = [2, 32], strides = [1, 1]} : vector<4x32xf32> to vector<2x32xf32>
    %19 = vector.extract_strided_slice %17 {offsets = [2, 0], sizes = [2, 32], strides = [1, 1]} : vector<4x32xf32> to vector<2x32xf32>
    %20 = arith.addf %18, %19 : vector<2x32xf32>
    %21 = arith.negf %20 : vector<2x32xf32>
    %22 = math.exp %21 : vector<2x32xf32>
    %cst_15 = arith.constant 1.000000e+00 : f32
    %23 = vector.broadcast %cst_15 : f32 to vector<2x32xf32>
    %24 = arith.addf %23, %22 : vector<2x32xf32>
    %25 = arith.divf %23, %24 : vector<2x32xf32>
    %26 = vector.shape_cast %25 : vector<2x32xf32> to vector<2x32x1xf32>
    %27 = vector.broadcast %26 : vector<2x32x1xf32> to vector<2x32x256xf32>
    %28 = arith.mulf %0, %27 : vector<2x32x256xf32>
    %c0_16 = arith.constant 0 : index
    %c0_17 = arith.constant 0 : index
    %c0_18 = arith.constant 0 : index
    %29 = vector.load %arg6[%c0_16, %c0_17, %c0_18] : memref<2x32x256xf32, #tpu.memory_space<vmem>>, vector<2x32x256xf32>
    tpu.vector_store %arg6[%c0_16, %c0_17, %c0_18], %28 {strides = array<i32>} : memref<2x32x256xf32, #tpu.memory_space<vmem>>, vector<2x32x256xf32>,
    return
  }
  func.func @transform_0(%arg0: i32) -> (i32, i32, i32) {
    %c0_i32 = arith.constant 0 : i32
    %c0_i32_0 = arith.constant 0 : i32
    %c0_i32_1 = arith.constant 0 : i32
    return %arg0, %c0_i32, %c0_i32_0 : i32, i32, i32
  }
  func.func @transform_1(%arg0: i32) -> (i32, i32) {
    %c0_i32 = arith.constant 0 : i32
    %c0_i32_0 = arith.constant 0 : i32
    %c0_i32_1 = arith.constant 0 : i32
    return %c0_i32, %c0_i32_0 : i32, i32
  }
  func.func @transform_2(%arg0: i32) -> (i32, i32) {
    %c0_i32 = arith.constant 0 : i32
    %c0_i32_0 = arith.constant 0 : i32
    %c0_i32_1 = arith.constant 0 : i32
    return %c0_i32, %c0_i32_0 : i32, i32
  }
  func.func @transform_3(%arg0: i32) -> (i32, i32) {
    %c0_i32 = arith.constant 0 : i32
    %c0_i32_0 = arith.constant 0 : i32
    %c0_i32_1 = arith.constant 0 : i32
    return %c0_i32, %c0_i32_0 : i32, i32
  }
  func.func @transform_4(%arg0: i32) -> (i32, i32) {
    %c0_i32 = arith.constant 0 : i32
    %c0_i32_0 = arith.constant 0 : i32
    %c0_i32_1 = arith.constant 0 : i32
    return %c0_i32, %c0_i32_0 : i32, i32
  }
  func.func @transform_5(%arg0: i32) -> (i32, i32, i32) {
    %c0_i32 = arith.constant 0 : i32
    %c0_i32_0 = arith.constant 0 : i32
    %c0_i32_1 = arith.constant 0 : i32
    return %arg0, %c0_i32, %c0_i32_0 : i32, i32, i32
  }
}

</mosaic_0001>

<bundles_post_ra>
// kernel: tpu_custom_call.1
= control target key start
LH: loop header
LB: loop body
LE: loop exit
PB: predicated region body
PF: predicated region fallthrough
CT: control target
= control target key end

     0   :  { %10 = vsyncpa [#allocation3], 0  ;;  %s737_s0 = inlined_call_operand.hbm [shape: f32[2,32,256], index: 0, kind: input, shape index: {}]   ;;  %s738_s1 = inlined_call_operand.vmem [shape: f32[32,2], index: 1, kind: input, shape index: {}]   ;;  %s739_s2 = inlined_call_operand.vmem [shape: f32[1,2], index: 2, kind: input, shape index: {}]   ;;  %s740_s3 = inlined_call_operand.vmem [shape: f32[2,32], index: 3, kind: input, shape index: {}]   ;;  %s741_s4 = inlined_call_operand.vmem [shape: f32[1,32], index: 4, kind: input, shape index: {}]   ;;  %s742_s5 = inlined_call_operand.hbm [shape: f32[2,32,256], index: 5, kind: output, shape index: {}]  }
   0x1   :  { %11 = vsyncpa [#allocation4], 0  ;;  %s566_s18 = smov [#allocation2]  }
   0x2   :  { %s17_s19 = sshll.u32 %s566_s18, 4  ;;  %s18_s19 = int_to_ptr.vmem [resolvable:$true] %s17_s19 }
   0x3   :  { %s530_s20 = scalar_lea.vmem %s18_s19, 2048  ;;  %p535_p1 = scmp.lt.s32.totalorder %s18_s19, %s18_s19 }
   0x4   :  { %p531_p0 = scmp.ne.s32.totalorder %s18_s19, %s530_s20  ;;  %p536_p2 = scmp.lt.s32.totalorder %s530_s20, %s530_s20 }
   0x6   :  { %p537_p3 = por %p536_p2, %p535_p1 }
   0x8   :  { %p538_p4 = pnand %p537_p3, %p531_p0 }
   0xa   :  { %541 = shalt.err (!%p538_p4)
}
   0xb   :  { %s567_s21 = smov 256   ;;  %s568_s22 = smov 16  }
   0xc   :  { %23 = dma.hbm_to_vmem [thread:$0]  %s737_s0, 2048, %s18_s19, [#allocation3], %s567_s21, %s567_s21, %s568_s22  }
   0xd   :  { %562 = dma.done.wait [#allocation3], 2048  }
   0xe   :  { %563 = vsyncadd [#allocation3], 4294965248  ;;  %v608_v0 = vld [vmem:[#allocation2 + $0x40] sm:$0xff]  ;;  %v610_v1 = vld [vmem:[#allocation2 + $0x48] sm:$0xff]  ;;  %v569_v32 = vmov 0.0   ;;  %vm570_vm0 = vmmov 0   ;;  %v115_v42 = vlaneseq }
   0xf   :  { %v612_v2 = vld [vmem:[#allocation2] sm:$0xff]  ;;  %v63_v3 = vadd.f32 %v610_v1, %v608_v0  ;;  %v616_v4 = vld [vmem:[#allocation2 + $0x8] sm:$0xff]  ;;  %v618_v5 = vld [vmem:[#allocation2 + $0x50] sm:$0xff]  ;;  %v95_v27 = vmax.f32 %v608_v0, %v610_v1  ;;  %496 = vmatprep.subr.mxu0 %v569_v32  ;;  %507 = vmatprep.subr.mxu1 %v569_v32  ;;  %vm126_vm1 = vcmask 130112   ;;  %vm133_vm2 = vcmask 195712  }
  0x10   :  { %v620_v6 = vld [vmem:[#allocation2 + $0x58] sm:$0xff]  ;;  %v51_v7 = vadd.f32 %v616_v4, %v612_v2  ;;  %v624_v8 = vld [vmem:[#allocation2 + $0x10] sm:$0xff]  ;;  %v632_v12 = vld [vmem:[#allocation2 + $0x60] sm:$0xff]  ;;  %v83_v25 = vmax.f32 %v612_v2, %v616_v4  ;;  %504 = vmatprep.mubr.msk.f32.mxu0 %vm570_vm0, %v569_v32  ;;  %509 = vmatprep.mubr.msk.f32.mxu1 %vm570_vm0, %v569_v32  ;;  %v116_v45 = vand.u32 127, %v115_v42  ;;  %v684_v47 = vshrl.u32 %v115_v42, 7 }
  0x11   :  { %v626_v9 = vld [vmem:[#allocation2 + $0x18] sm:$0xff]  ;;  %64 = vadd.xlane.f32.xlu1 %v63_v3  ;;  %v66_v10 = vadd.f32 %v620_v6, %v618_v5  ;;  %v634_v13 = vld [vmem:[#allocation2 + $0x68] sm:$0xff]  ;;  %v636_v14 = vld [vmem:[#allocation2 + $0x20] sm:$0xff]  ;;  %v98_v26 = vmax.f32 %v618_v5, %v620_v6  ;;  %vm140_vm3 = vcmask 261312   ;;  %vm161_vm4 = vcmask 1041409  }
  0x12   :  { %52 = vadd.xlane.f32.xlu0 %v51_v7  ;;  %v54_v11 = vadd.f32 %v626_v9, %v624_v8  ;;  %v638_v15 = vld [vmem:[#allocation2 + $0x28] sm:$0xff]  ;;  %v69_v16 = vadd.f32 %v634_v13, %v632_v12  ;;  %v644_v18 = vld [vmem:[#allocation2 + $0x70] sm:$0xff]  ;;  %v646_v19 = vld [vmem:[#allocation2 + $0x78] sm:$0xff]  ;;  %v86_v24 = vmax.f32 %v624_v8, %v626_v9  ;;  %v101_v28 = vmax.f32 %v632_v12, %v634_v13 }
  0x13   :  { %v57_v17 = vadd.f32 %v638_v15, %v636_v14  ;;  %v648_v20 = vld [vmem:[#allocation2 + $0x30] sm:$0xff]  ;;  %v650_v21 = vld [vmem:[#allocation2 + $0x38] sm:$0xff]  ;;  %v72_v22 = vadd.f32 %v646_v19, %v644_v18  ;;  %v89_v29 = vmax.f32 %v636_v14, %v638_v15  ;;  %v104_v30 = vmax.f32 %v644_v18, %v646_v19  ;;  %v216_v35 = vld [vmem:[%s738_s1 + $0x8] sm:$0xff] }
  0x14   :  { %v60_v23 = vadd.f32 %v650_v21, %v648_v20  ;;  %v92_v31 = vmax.f32 %v648_v20, %v650_v21  ;;  %v218_v33 = vld [vmem:[%s738_s1 + $0x18] sm:$0xff]  ;;  %v217_v34 = vld [vmem:[%s738_s1 + $0x10] sm:$0xff]  ;;  %v215_v36 = vld [vmem:[%s738_s1] sm:$0xff]  ;;  %v121_v48 = vadd.s32 4294967288, %v116_v45  ;;  %v128_v49 = vadd.s32 4294967280, %v116_v45 }
  0x15   :  { %67 = vadd.xlane.f32.xlu1 %v66_v10  ;;  %497 = vmatpush3.msra.mxu0 %v218_v33  ;;  %v135_v51 = vadd.s32 4294967272, %v116_v45  ;;  %v119_v53 = vsub.s32 %v116_v45, %v684_v47  ;;  %vm210_vm5 = vcmask 1043459   ;;  %vm213_vm6 = vcmask 1041408  }
  0x16   :  { %55 = vadd.xlane.f32.xlu0 %v54_v11  ;;  %498 = vmatprep.subr.mxu0 %v569_v32  ;;  %v124_v54 = vsub.s32 %v121_v48, %v684_v47  ;;  %v131_v56 = vsub.s32 %v128_v49, %v684_v47  ;;  %vm226_vm7 = vcmask 261120   ;;  %vm309_vm8 = vcmask 15360  }
  0x17   :  { %499 = vmatpush3.msra.mxu0 %v217_v34  ;;  %v138_v63 = vsub.s32 %v135_v51, %v684_v47 }
  0x18   :  { %500 = vmatprep.subr.mxu0 %v569_v32 }
  0x19   :  { %70 = vadd.xlane.f32.xlu1 %v69_v16  ;;  %501 = vmatpush3.msra.mxu0 %v216_v35 }
  0x1a   :  { %58 = vadd.xlane.f32.xlu0 %v57_v17  ;;  %502 = vmatprep.subr.mxu0 %v569_v32 }
  0x1b   :  { %503 = vmatpush3.msra.mxu0 %v215_v36 }
  0x1d   :  { %73 = vadd.xlane.f32.xlu1 %v72_v22 }
  0x1e   :  { %61 = vadd.xlane.f32.xlu0 %v60_v23 }
  0x21   :  { %87 = vmax.xlane.f32.xlu1 %v86_v24 }
  0x22   :  { %84 = vmax.xlane.f32.xlu0 %v83_v25 }
  0x25   :  { %99 = vmax.xlane.f32.xlu1 %v98_v26 }
  0x26   :  { %96 = vmax.xlane.f32.xlu0 %v95_v27 }
  0x29   :  { %102 = vmax.xlane.f32.xlu1 %v101_v28 }
  0x2a   :  { %90 = vmax.xlane.f32.xlu0 %v89_v29 }
  0x2d   :  { %105 = vmax.xlane.f32.xlu1 %v104_v30 }
  0x2e   :  { %93 = vmax.xlane.f32.xlu0 %v92_v31 }
  0x9a   :  { %v65_v37 = vpop.xlane.xlu1 %64 }
  0x9b   :  { %v53_v38 = vpop.xlane.xlu0 %52  ;;  %v79_v57 = vmul.f32 0.00390625, %v65_v37 }
  0x9c   :  { %v75_v58 = vmul.f32 0.00390625, %v53_v38 }
  0x9d   :  { %v145_v16 = vrot.slane %v79_v57, %v119_v53 }
  0x9e   :  { %v68_v39 = vpop.xlane.xlu1 %67  ;;  %v120_v17 = vrot.slane %v75_v58, %v119_v53 }
  0x9f   :  { %v56_v40 = vpop.xlane.xlu0 %55  ;;  %v80_v55 = vmul.f32 0.00390625, %v68_v39 }
  0xa0   :  { %v76_v59 = vmul.f32 0.00390625, %v56_v40 }
  0xa1   :  { %v149_v11 = vrot.slane %v80_v55, %v124_v54  ;;  %v301_v55 = vld [vmem:[%s740_s3] sm:$0x3] }
  0xa2   :  { %v71_v41 = vpop.xlane.xlu1 %70  ;;  %v125_v22 = vrot.slane %v76_v59, %v124_v54  ;;  %508 = vmatpush3.msk.msra.mxu1 %vm213_vm6, %v301_v55 }
  0xa3   :  { %v59_v43 = vpop.xlane.xlu0 %58  ;;  %v81_v60 = vmul.f32 0.00390625, %v71_v41  ;;  %v150_v34 = vsel %vm126_vm1, %v149_v11, %v145_v16 }
  0xa4   :  { %v77_v62 = vmul.f32 0.00390625, %v59_v43  ;;  %v127_v36 = vsel %vm126_vm1, %v125_v22, %v120_v17  ;;  %v398_v22 = vsub.s32 0, %v684_v47 }
  0xa5   :  { %v154_v23 = vrot.slane %v81_v60, %v131_v56 }
  0xa6   :  { %v74_v44 = vpop.xlane.xlu1 %73  ;;  %v132_v25 = vrot.slane %v77_v62, %v131_v56 }
  0xa7   :  { %v62_v46 = vpop.xlane.xlu0 %61  ;;  %v82_v3 = vmul.f32 0.00390625, %v74_v44  ;;  %v155_v37 = vsel %vm133_vm2, %v154_v23, %v150_v34 }
  0xa8   :  { %v78_v10 = vmul.f32 0.00390625, %v62_v46  ;;  %v134_v39 = vsel %vm133_vm2, %v132_v25, %v127_v36  ;;  %v417_v25 = vsub.s32 1, %v684_v47 }
  0xa9   :  { %v159_v26 = vrot.slane %v82_v3, %v138_v63 }
  0xaa   :  { %v88_v50 = vpop.xlane.xlu1 %87  ;;  %v139_v30 = vrot.slane %v78_v10, %v138_v63 }
  0xab   :  { %v85_v52 = vpop.xlane.xlu0 %84  ;;  %v179_v31 = vrot.slane %v88_v50, %v124_v54  ;;  %v160_v40 = vsel %vm140_vm3, %v159_v26, %v155_v37 }
  0xac   :  { %v175_v32 = vrot.slane %v85_v52, %v119_v53  ;;  %v141_v44 = vsel %vm140_vm3, %v139_v30, %v134_v39 }
  0xad   :  { %v162_v52 = vsel %vm161_vm4, %v160_v40, %v141_v44 }
  0xae   :  { %v100_v61 = vpop.xlane.xlu1 %99  ;;  %v180_v45 = vsel %vm126_vm1, %v179_v31, %v175_v32 }
  0xaf   :  { %v97_v7 = vpop.xlane.xlu0 %96  ;;  %v198_v27 = vrot.slane %v100_v61, %v124_v54  ;;  %v485_v61 = vld [vmem:[%s741_s4] ss:$0 sm:$0xff] }
  0xb0   :  { %v194_v28 = vrot.slane %v97_v7, %v119_v53 }
  0xb2   :  { %v103_v24 = vpop.xlane.xlu1 %102  ;;  %v199_v41 = vsel %vm126_vm1, %v198_v27, %v194_v28 }
  0xb3   :  { %v91_v29 = vpop.xlane.xlu0 %90  ;;  %v203_v33 = vrot.slane %v103_v24, %v131_v56 }
  0xb4   :  { %v184_v35 = vrot.slane %v91_v29, %v131_v56  ;;  %v483_v56 = vld [vmem:[%s739_s2] ss:$0 sm:$0xff]  ;;  %s571_s2 = smov [#allocation5]  }
  0xb5   :  { %v204_v46 = vsel %vm133_vm2, %v203_v33, %v199_v41  ;;  %s471_s3 = sshll.u32 %s571_s2, 4  ;;  %s472_s3 = int_to_ptr.vmem [resolvable:$true] %s471_s3 }
  0xb6   :  { %v106_v38 = vpop.xlane.xlu1 %105  ;;  %v185_v49 = vsel %vm133_vm2, %v184_v35, %v180_v45  ;;  %s542_s4 = scalar_lea.vmem %s472_s3, 2048  ;;  %p547_p6 = scmp.lt.s32.totalorder %s472_s3, %s472_s3 }
  0xb7   :  { %v208_v42 = vrot.slane %v106_v38, %v138_v63  ;;  %v94_v43 = vpop.xlane.xlu0 %93  ;;  %p543_p5 = scmp.ne.s32.totalorder %s472_s3, %s542_s4  ;;  %p548_p7 = scmp.lt.s32.totalorder %s542_s4, %s542_s4 }
  0xb8   :  { %v189_v48 = vrot.slane %v94_v43, %v138_v63 }
  0xb9   :  { %v209_v50 = vsel %vm140_vm3, %v208_v42, %v204_v46  ;;  %p549_p8 = por %p548_p7, %p547_p6 }
  0xba   :  { %v190_v51 = vsel %vm140_vm3, %v189_v48, %v185_v49 }
  0xbb   :  { %v211_v53 = vsel %vm210_vm5, %v209_v50, %v190_v51  ;;  %p550_p9 = pnand %p549_p8, %p543_p5 }
  0xbc   :  { %v214_v54 = vsel %vm213_vm6, %v162_v52, %v211_v53 }
  0xbd   :  { %505 = vmatmul.mubr.msk.f32.vlgmr.msra.gmra.mxu0 %vm226_vm7, %v214_v54 }
 0x17d   :  { %v296_v57 = vpop.f32.mrf.mxu0 }
 0x17e   :  { %v297_v58 = vadd.f32 %v483_v56, %v296_v57 }
 0x17f   :  { %v506_v59 = vpop.f32.mrf.mxu0 }
 0x180   :  { %v300_v60 = vmax.f32 %v297_v58, 0.0 }
 0x182   :  { %510 = vmatmul.mubr.msk.f32.vlgmr.msra.gmra.mxu1 %vm309_vm8, %v300_v60 }
 0x242   :  { %v382_v62 = vpop.f32.mrf.mxu1 }
 0x243   :  { %v383_v63 = vadd.f32 %v485_v61, %v382_v62 }
 0x244   :  { %v511_v3 = vpop.f32.mrf.mxu1 }
 0x245   :  { %v387_v7 = vrot.slane %v383_v63, 2 }
 0x247   :  { %v389_v10 = vadd.f32 %v387_v7, %v383_v63 }
 0x249   :  { %v488_v11 = vmul.f32 -1.442695, %v389_v10 }
 0x24b   :  { %518 = vpow2.f32 %v488_v11 }
 0x258   :  { %v519_v16 = vpop.eup %518 }
 0x259   :  { %v393_v17 = vadd.f32 1.0, %v519_v16 }
 0x25b   :  { %520 = vrcp.f32 %v393_v17 }
 0x268   :  { %v521_v23 = vpop.eup %520 }
 0x269   :  { %v399_v24 = vrot.slane %v521_v23, %v398_v22  ;;  %v418_v26 = vrot.slane %v521_v23, %v417_v25 }
 0x26b   :  { %405 = vbcast.lane.b32.xlu1 %v399_v24, 264  ;;  %401 = vbcast.lane.b32.xlu0 %v399_v24, 256 }
 0x26f   :  { %409 = vbcast.lane.b32.xlu1 %v399_v24, 272  ;;  %420 = vbcast.lane.b32.xlu0 %v418_v26, 256 }
 0x273   :  { %413 = vbcast.lane.b32.xlu1 %v399_v24, 280  ;;  %428 = vbcast.lane.b32.xlu0 %v418_v26, 272 }
 0x277   :  { %424 = vbcast.lane.b32.xlu1 %v418_v26, 264 }
 0x27b   :  { %432 = vbcast.lane.b32.xlu1 %v418_v26, 280 }
 0x2dd   :  { %v406_v27 = vpop.permute.xlu1 %405  ;;  %v402_v28 = vpop.permute.xlu0 %401 }
 0x2de   :  { %v436_v29 = vmul.f32 %v406_v27, %v624_v8  ;;  %v437_v30 = vmul.f32 %v406_v27, %v626_v9  ;;  %v434_v31 = vmul.f32 %v402_v28, %v612_v2  ;;  %v435_v32 = vmul.f32 %v402_v28, %v616_v4 }
 0x2e0   :  { %452 = vst [vmem:[#allocation5 + $0x10] sm:$0xff] %v436_v29  ;;  %453 = vst [vmem:[#allocation5 + $0x18] sm:$0xff] %v437_v30 }
 0x2e1   :  { %450 = vst [vmem:[#allocation5] sm:$0xff] %v434_v31  ;;  %451 = vst [vmem:[#allocation5 + $0x8] sm:$0xff] %v435_v32  ;;  %v410_v47 = vpop.permute.xlu1 %409  ;;  %v421_v33 = vpop.permute.xlu0 %420 }
 0x2e2   :  { %v438_v34 = vmul.f32 %v410_v47, %v636_v14  ;;  %v439_v35 = vmul.f32 %v410_v47, %v638_v15  ;;  %v442_v36 = vmul.f32 %v421_v33, %v608_v0  ;;  %v443_v8 = vmul.f32 %v421_v33, %v610_v1 }
 0x2e4   :  { %454 = vst [vmem:[#allocation5 + $0x20] sm:$0xff] %v438_v34  ;;  %455 = vst [vmem:[#allocation5 + $0x28] sm:$0xff] %v439_v35 }
 0x2e5   :  { %458 = vst [vmem:[#allocation5 + $0x40] sm:$0xff] %v442_v36  ;;  %459 = vst [vmem:[#allocation5 + $0x48] sm:$0xff] %v443_v8  ;;  %v414_v2 = vpop.permute.xlu1 %413  ;;  %v429_v4 = vpop.permute.xlu0 %428 }
 0x2e6   :  { %v440_v9 = vmul.f32 %v414_v2, %v648_v20  ;;  %v441_v37 = vmul.f32 %v414_v2, %v650_v21  ;;  %v446_v38 = vmul.f32 %v429_v4, %v632_v12  ;;  %v447_v14 = vmul.f32 %v429_v4, %v634_v13 }
 0x2e8   :  { %456 = vst [vmem:[#allocation5 + $0x30] sm:$0xff] %v440_v9  ;;  %457 = vst [vmem:[#allocation5 + $0x38] sm:$0xff] %v441_v37 }
 0x2e9   :  { %462 = vst [vmem:[#allocation5 + $0x60] sm:$0xff] %v446_v38  ;;  %463 = vst [vmem:[#allocation5 + $0x68] sm:$0xff] %v447_v14  ;;  %v425_v0 = vpop.permute.xlu1 %424 }
 0x2ea   :  { %v444_v1 = vmul.f32 %v425_v0, %v618_v5  ;;  %v445_v15 = vmul.f32 %v425_v0, %v620_v6 }
 0x2ec   :  { %460 = vst [vmem:[#allocation5 + $0x50] sm:$0xff] %v444_v1  ;;  %461 = vst [vmem:[#allocation5 + $0x58] sm:$0xff] %v445_v15 }
 0x2ed   :  { %v433_v20 = vpop.permute.xlu1 %432 }
 0x2ee   :  { %v448_v21 = vmul.f32 %v433_v20, %v644_v18  ;;  %v449_v12 = vmul.f32 %v433_v20, %v646_v19 }
 0x2f0   :  { %464 = vst [vmem:[#allocation5 + $0x70] sm:$0xff] %v448_v21  ;;  %465 = vst [vmem:[#allocation5 + $0x78] sm:$0xff] %v449_v12 }
 0x2f1   :  { %553 = shalt.err (!%p550_p9)
}
 0x2f2   :  { %477 = dma.vmem_to_hbm [thread:$0]  %s472_s3, 2048, %s742_s5, [#allocation4], %s567_s21, %s567_s21, %s568_s22  }
 0x2f3   :  { %564 = dma.done.wait [#allocation4], 2048  }
 0x2f4   :  { %565 = vsyncadd [#allocation4], 4294965248 }
 0x2f5   :  { %481 = vsyncpa [#allocation3], 1 }
 0x2f6   :  { %482 = vsyncpa [#allocation4], 1 }

</bundles_post_ra>
